<compile_context>
chip_gen: v7x
topology: tpu7x:2x2x1
jax: 0.10.0
libtpu: 0.0.40
codegen_flags: <defaults>
</compile_context>

<pallas_src>
import functools

import jax
import jax.numpy as jnp
from jax.experimental import pallas as pl
from jax.experimental.pallas import tpu as pltpu


def _round_up(x: int, m: int) -> int:
    return ((x + m - 1) // m) * m


def _pick_tile(desired: int, dim_aligned: int, unit: int = 128) -> int:
    """Largest multiple of `unit` <= desired that divides dim_aligned.

    dim_aligned must itself be a multiple of `unit`, so this always terminates
    with a value >= unit.  Guarantees zero padding beyond `unit`-alignment.
    """
    t = max(unit, (min(desired, dim_aligned) // unit) * unit)
    while dim_aligned % t:
        t -= unit
    return t


def _linear_kernel(x_ref, w_ref, b_ref, o_ref, acc_ref):
    k = pl.program_id(2)

    @pl.when(k == 0)
    def _():
        acc_ref[...] = jnp.zeros_like(acc_ref)

    acc_ref[...] += jnp.dot(
        x_ref[...], w_ref[...], preferred_element_type=jnp.float32
    )

    @pl.when(k == pl.num_programs(2) - 1)
    def _():
        # Bias added once (not per K step), in f32, then cast to output dtype.
        o_ref[...] = (acc_ref[...] + b_ref[...]).astype(o_ref.dtype)


@functools.partial(jax.jit, static_argnames=("tm", "tn", "tk", "compute_dtype"))
def _linear_pallas(x, wp, bp, *, tm, tn, tk, compute_dtype):
    """Padded Linear: x (B, IN) @ wp (INp, OUTp) + bp (1, OUTp) -> (Bp, OUTp)."""
    B, IN = x.shape
    INp, OUTp = wp.shape
    out_dtype = x.dtype

    Bp = _round_up(B, tm)

    # Pad/cast the activations only when actually needed (shapes are static under
    # jit, so this is a trace-time decision -> no extra HBM pass when aligned).
    if (Bp, INp) != (B, IN) or x.dtype != compute_dtype:
        xp = jnp.pad(x, ((0, Bp - B), (0, INp - IN))).astype(compute_dtype)
    else:
        xp = x

    grid = (Bp // tm, OUTp // tn, INp // tk)

    cost = pl.CostEstimate(
        flops=2 * Bp * INp * OUTp,
        transcendentals=0,
        bytes_accessed=int(
            xp.size * xp.dtype.itemsize * (OUTp // tn)          # x re-read per N tile
            + wp.size * wp.dtype.itemsize * (Bp // tm)          # w re-read per M tile
            + bp.size * bp.dtype.itemsize
            + Bp * OUTp * jnp.dtype(out_dtype).itemsize
        ),
    )

    out = pl.pallas_call(
        _linear_kernel,
        out_shape=jax.ShapeDtypeStruct((Bp, OUTp), out_dtype),
        grid_spec=pltpu.PrefetchScalarGridSpec(
            num_scalar_prefetch=0,
            grid=grid,
            in_specs=[
                pl.BlockSpec((tm, tk), lambda i, j, k: (i, k)),
                pl.BlockSpec((tk, tn), lambda i, j, k: (k, j)),
                pl.BlockSpec((1, tn), lambda i, j, k: (0, j)),
            ],
            out_specs=pl.BlockSpec((tm, tn), lambda i, j, k: (i, j)),
            scratch_shapes=[pltpu.VMEM((tm, tn), jnp.float32)],
        ),
        compiler_params=pltpu.CompilerParams(
            dimension_semantics=("parallel", "parallel", "arbitrary"),
        ),
        cost_estimate=cost,
    )(xp, wp, bp)
    return out


class ModelWrapper:
    """JAX analogue of colossalai's ModelWrapper: pure delegation to the wrapped module."""

    def __init__(self, module):
        self.module = module

    def unwrap(self):
        if isinstance(self.module, ModelWrapper):
            return self.module.unwrap()
        return self.module

    def __call__(self, *args, **kwargs):
        return self.module(*args, **kwargs)


class PallasLinear:
    """Concrete wrapped module: y = x @ W + b, implemented with the Pallas kernel."""

    def __init__(self, w, b, *, compute_dtype=jnp.bfloat16,
                 tm=256, tn=512, tk=512, k_collapse_limit=2048):
        IN, OUT = w.shape
        self.out_features = OUT
        self.compute_dtype = compute_dtype

        INp = _round_up(IN, 128)
        OUTp = _round_up(OUT, 128)

        # K fast path: one K tile when the 128-aligned K fits comfortably in VMEM
        # (no accumulator revisits, half the grid steps for small problems).
        if INp <= k_collapse_limit:
            self.tk = INp
        else:
            self.tk = _pick_tile(tk, INp, 128)
        # N tile: divisor of the 128-aligned OUT (no over-padding of the weights).
        self.tn = _pick_tile(tn, OUTp, 128)
        # M tile chosen per call from the batch size (multiple of 16 for bf16 packing).
        self.tm_max = tm

        # Hoist the weight/bias pad + cast to construction time: done once, not
        # re-materialized (full extra HBM read+write of W) on every forward.
        self.wp = jnp.pad(w, ((0, INp - IN), (0, OUTp - OUT))).astype(compute_dtype)
        self.bp = jnp.pad(jnp.reshape(b, (1, -1)),
                          ((0, 0), (0, OUTp - OUT))).astype(jnp.float32)

    def __call__(self, x):
        B = x.shape[0]
        tm = min(self.tm_max, _round_up(B, 16))
        out = _linear_pallas(x, self.wp, self.bp,
                             tm=tm, tn=self.tn, tk=self.tk,
                             compute_dtype=self.compute_dtype)
        return out[:B, :self.out_features]


def _reference(x, w, b):
    # Same bf16-operand / f32-accumulate numerics as the kernel.
    return jnp.dot(x.astype(jnp.bfloat16), w.astype(jnp.bfloat16),
                   preferred_element_type=jnp.float32) + b


if __name__ == "__main__":
    key = jax.random.PRNGKey(0)
    kx, kw, kb = jax.random.split(key, 3)

    # Case 1: aligned small shapes -> single-pass K fast path, no activation pad.
    B, IN, OUT = 64, 256, 128
    x = jax.random.normal(kx, (B, IN), dtype=jnp.float32)
    w = jax.random.normal(kw, (IN, OUT), dtype=jnp.float32) * 0.05
    b = jax.random.normal(kb, (1, OUT), dtype=jnp.float32) * 0.01

    wrapped = ModelWrapper(PallasLinear(w, b))
    out = jax.block_until_ready(wrapped(x))
    ref = _reference(x, w, b)
    assert out.shape == (B, OUT)
    assert jnp.allclose(out, ref, atol=1e-2, rtol=1e-2), "mismatch vs reference (case 1)"
    assert wrapped.unwrap() is wrapped.module

    # Case 2: unaligned tiny shapes -> exercises the padding path (8,32,48)->(16,128,128).
    xs = jax.random.normal(kx, (8, 32), dtype=jnp.float32)
    ws = jax.random.normal(kw, (32, 48), dtype=jnp.float32) * 0.05
    bs = jax.random.normal(kb, (1, 48), dtype=jnp.float32) * 0.01
    out_s = jax.block_until_ready(ModelWrapper(PallasLinear(ws, bs))(xs))
    ref_s = _reference(xs, ws, bs)
    assert out_s.shape == (8, 48)
    assert jnp.allclose(out_s, ref_s, atol=1e-2, rtol=1e-2), "mismatch vs reference (case 2)"

    # Case 3: force the general multi-tile path with a K reduction (grid = (2, 3, 2)).
    B3, IN3, OUT3 = 256, 512, 384
    x3 = jax.random.normal(kx, (B3, IN3), dtype=jnp.float32)
    w3 = jax.random.normal(kw, (IN3, OUT3), dtype=jnp.float32) * 0.05
    b3 = jax.random.normal(kb, (1, OUT3), dtype=jnp.float32) * 0.01
    lin3 = PallasLinear(w3, b3, tm=128, tn=128, tk=256, k_collapse_limit=0)
    out3 = jax.block_until_ready(ModelWrapper(lin3)(x3))
    ref3 = _reference(x3, w3, b3)
    assert out3.shape == (B3, OUT3)
    assert jnp.allclose(out3, ref3, atol=1e-2, rtol=1e-2), "mismatch vs reference (case 3)"

    print("KERNEL_OK")
</pallas_src>

<mosaic_0001>
module attributes {stable_mosaic.version = 11 : i64} {
  func.func @_linear_kernel(%arg0: i32, %arg1: i32, %arg2: i32, %arg3: memref<64x256xbf16, #tpu.memory_space<vmem>>, %arg4: memref<256x128xbf16, #tpu.memory_space<vmem>>, %arg5: memref<1x128xf32, #tpu.memory_space<vmem>>, %arg6: memref<64x128xf32, #tpu.memory_space<vmem>>, %arg7: memref<64x128xf32, #tpu.memory_space<vmem>>) attributes {dimension_semantics = [#tpu.dimension_semantics<parallel>, #tpu.dimension_semantics<parallel>, #tpu.dimension_semantics<arbitrary>], iteration_bounds = array<i64: 1, 1, 1>, scalar_prefetch = 0 : i64, scratch_operands = 1 : i64, tpu.core_type = #tpu.core_type<tc>, window_params = [{transform_indices = @transform_0, window_bounds = array<i64: 64, 256>}, {transform_indices = @transform_1, window_bounds = array<i64: 256, 128>}, {transform_indices = @transform_2, window_bounds = array<i64: 1, 128>}, {transform_indices = @transform_3, window_bounds = array<i64: 64, 128>}]} {
    %c0_i32 = arith.constant 0 : i32
    %0 = arith.cmpi eq, %arg2, %c0_i32 : i32
    %1 = arith.extui %0 : i1 to i32
    %c0_i32_0 = arith.constant 0 : i32
    %2 = arith.cmpi ne, %1, %c0_i32_0 : i32
    scf.if %2 {
      %cst_10 = arith.constant 0.000000e+00 : f32
      %12 = vector.broadcast %cst_10 : f32 to vector<64x128xf32>
      %c0_11 = arith.constant 0 : index
      %c0_12 = arith.constant 0 : index
      %13 = vector.load %arg7[%c0_11, %c0_12] : memref<64x128xf32, #tpu.memory_space<vmem>>, vector<64x128xf32>
      tpu.vector_store %arg7[%c0_11, %c0_12], %12 {strides = array<i32>} : memref<64x128xf32, #tpu.memory_space<vmem>>, vector<64x128xf32>,
    } else {
    }
    %c0 = arith.constant 0 : index
    %c0_1 = arith.constant 0 : index
    %3 = vector.load %arg7[%c0, %c0_1] : memref<64x128xf32, #tpu.memory_space<vmem>>, vector<64x128xf32>
    %c0_2 = arith.constant 0 : index
    %c0_3 = arith.constant 0 : index
    %4 = vector.load %arg3[%c0_2, %c0_3] : memref<64x256xbf16, #tpu.memory_space<vmem>>, vector<64x256xbf16>
    %c0_4 = arith.constant 0 : index
    %c0_5 = arith.constant 0 : index
    %5 = vector.load %arg4[%c0_4, %c0_5] : memref<256x128xbf16, #tpu.memory_space<vmem>>, vector<256x128xbf16>
    %cst = arith.constant dense<0.000000e+00> : vector<64x128xf32>
    %6 = tpu.matmul %4, %5, %cst {dimension_numbers = #tpu.dot_dimension_numbers<[1], [0], [0], [1], [0, 0, 1, 1], [], []>} : vector<64x256xbf16>, vector<256x128xbf16>, vector<64x128xf32> -> vector<64x128xf32>
    %7 = arith.addf %3, %6 : vector<64x128xf32>
    %c0_6 = arith.constant 0 : index
    %c0_7 = arith.constant 0 : index
    %8 = vector.load %arg7[%c0_6, %c0_7] : memref<64x128xf32, #tpu.memory_space<vmem>>, vector<64x128xf32>
    tpu.vector_store %arg7[%c0_6, %c0_7], %7 {strides = array<i32>} : memref<64x128xf32, #tpu.memory_space<vmem>>, vector<64x128xf32>,
    %c0_i32_8 = arith.constant 0 : i32
    %9 = arith.cmpi eq, %arg2, %c0_i32_8 : i32
    %10 = arith.extui %9 : i1 to i32
    %c0_i32_9 = arith.constant 0 : i32
    %11 = arith.cmpi ne, %10, %c0_i32_9 : i32
    scf.if %11 {
      %c0_10 = arith.constant 0 : index
      %c0_11 = arith.constant 0 : index
      %12 = vector.load %arg7[%c0_10, %c0_11] : memref<64x128xf32, #tpu.memory_space<vmem>>, vector<64x128xf32>
      %c0_12 = arith.constant 0 : index
      %c0_13 = arith.constant 0 : index
      %13 = vector.load %arg5[%c0_12, %c0_13] : memref<1x128xf32, #tpu.memory_space<vmem>>, vector<1x128xf32>
      %14 = vector.broadcast %13 : vector<1x128xf32> to vector<64x128xf32>
      %15 = arith.addf %12, %14 : vector<64x128xf32>
      %c0_14 = arith.constant 0 : index
      %c0_15 = arith.constant 0 : index
      %16 = vector.load %arg6[%c0_14, %c0_15] : memref<64x128xf32, #tpu.memory_space<vmem>>, vector<64x128xf32>
      tpu.vector_store %arg6[%c0_14, %c0_15], %15 {strides = array<i32>} : memref<64x128xf32, #tpu.memory_space<vmem>>, vector<64x128xf32>,
    } else {
    }
    return
  }
  func.func @transform_0(%arg0: i32, %arg1: i32, %arg2: i32) -> (i32, i32) {
    %c0_i32 = arith.constant 0 : i32
    return %arg0, %arg2 : i32, i32
  }
  func.func @transform_1(%arg0: i32, %arg1: i32, %arg2: i32) -> (i32, i32) {
    %c0_i32 = arith.constant 0 : i32
    return %arg2, %arg1 : i32, i32
  }
  func.func @transform_2(%arg0: i32, %arg1: i32, %arg2: i32) -> (i32, i32) {
    %c0_i32 = arith.constant 0 : i32
    %c0_i32_0 = arith.constant 0 : i32
    return %c0_i32, %arg1 : i32, i32
  }
  func.func @transform_3(%arg0: i32, %arg1: i32, %arg2: i32) -> (i32, i32) {
    %c0_i32 = arith.constant 0 : i32
    return %arg0, %arg1 : i32, i32
  }
}

</mosaic_0001>

<bundles_post_ra>
// kernel: _linear_pallas.1
= control target key start
LH: loop header
LB: loop body
LE: loop exit
PB: predicated region body
PF: predicated region fallthrough
CT: control target
= control target key end

     0   :  { %s589_s0 = inlined_call_operand.vmem [shape: bf16[64,256], index: 0, kind: input, shape index: {}]   ;;  %s590_s1 = inlined_call_operand.vmem [shape: bf16[256,128], index: 1, kind: input, shape index: {}]   ;;  %s591_s2 = inlined_call_operand.vmem [shape: f32[1,128], index: 2, kind: input, shape index: {}]   ;;  %s592_s3 = inlined_call_operand.hbm [shape: f32[64,128], index: 3, kind: output, shape index: {}]  }
   0x1   :  { %v427_v0 = vld [vmem:[%s590_s1 + $0x40] sm:$0xff]   ;;  %v429_v2 = vld [vmem:[%s590_s1 + $0x48] sm:$0xff]   ;;  %v431_v4 = vld [vmem:[%s590_s1 + $0x50] sm:$0xff]  }
   0x2   :  { %v428_v1 = vld [vmem:[%s590_s1] sm:$0xff]   ;;  %368 = vmatprep.subr.bf16.mxu0 %v427_v0  ;;  %408 = vmatprep.subr.bf16.mxu1 %v427_v0  ;;  %v430_v3 = vld [vmem:[%s590_s1 + $0x8] sm:$0xff]   ;;  %v432_v5 = vld [vmem:[%s590_s1 + $0x10] sm:$0xff]  }
   0x3   :  { %369 = vmatpush3.bf16.msra.mxu0 %v428_v1  ;;  %416 = vmatpush3.bf16.msra.mxu1 %v428_v1  ;;  %v433_v6 = vld [vmem:[%s590_s1 + $0x58] sm:$0xff]   ;;  %v435_v8 = vld [vmem:[%s590_s1 + $0x60] sm:$0xff]   ;;  %v437_v10 = vld [vmem:[%s590_s1 + $0x68] sm:$0xff]  }
   0x4   :  { %370 = vmatprep.subr.bf16.mxu0 %v429_v2  ;;  %409 = vmatprep.subr.bf16.mxu1 %v429_v2  ;;  %v434_v7 = vld [vmem:[%s590_s1 + $0x18] sm:$0xff]   ;;  %v436_v9 = vld [vmem:[%s590_s1 + $0x20] sm:$0xff]   ;;  %v438_v13 = vld [vmem:[%s590_s1 + $0x28] sm:$0xff]  }
   0x5   :  { %v445_v11 = vld [vmem:[%s589_s0 + $0x4] ss:$8 sps:$4 sm:$0xff]   ;;  %v439_v14 = vld [vmem:[%s590_s1 + $0x70] sm:$0xff]  }
   0x6   :  { %v448_v12 = vld [vmem:[%s589_s0 + $0x24] ss:$8 sps:$4 sm:$0xff]   ;;  %244 = vmatprep.mubr.bf16.mxu0 %v445_v11 }
   0x7   :  { %371 = vmatpush3.bf16.msra.mxu0 %v430_v3  ;;  %417 = vmatpush3.bf16.msra.mxu1 %v430_v3 }
   0x8   :  { %372 = vmatprep.subr.bf16.mxu0 %v431_v4  ;;  %410 = vmatprep.subr.bf16.mxu1 %v431_v4 }
   0x9   :  { %260 = vmatprep.mubr.bf16.mxu1 %v448_v12 }
   0xb   :  { %373 = vmatpush3.bf16.msra.mxu0 %v432_v5  ;;  %418 = vmatpush3.bf16.msra.mxu1 %v432_v5 }
   0xc   :  { %374 = vmatprep.subr.bf16.mxu0 %v433_v6  ;;  %411 = vmatprep.subr.bf16.mxu1 %v433_v6 }
   0xf   :  { %375 = vmatpush3.bf16.msra.mxu0 %v434_v7  ;;  %419 = vmatpush3.bf16.msra.mxu1 %v434_v7 }
  0x10   :  { %376 = vmatprep.subr.bf16.mxu0 %v435_v8  ;;  %412 = vmatprep.subr.bf16.mxu1 %v435_v8 }
  0x13   :  { %377 = vmatpush3.bf16.msra.mxu0 %v436_v9  ;;  %420 = vmatpush3.bf16.msra.mxu1 %v436_v9 }
  0x14   :  { %378 = vmatprep.subr.bf16.mxu0 %v437_v10  ;;  %413 = vmatprep.subr.bf16.mxu1 %v437_v10 }
  0x15   :  { %8 = vsyncpa [#allocation4], 0  ;;  %v440_v15 = vld [vmem:[%s590_s1 + $0x30] sm:$0xff]   ;;  %v441_v16 = vld [vmem:[%s590_s1 + $0x78] sm:$0xff]  }
  0x16   :  { %v442_v17 = vld [vmem:[%s590_s1 + $0x38] sm:$0xff]   ;;  %v443_v18 = vld [vmem:[%s589_s0] ss:$8 sps:$4 sm:$0xff]  }
  0x17   :  { %379 = vmatpush3.bf16.msra.mxu0 %v438_v13  ;;  %421 = vmatpush3.bf16.msra.mxu1 %v438_v13  ;;  %v446_v19 = vld [vmem:[%s589_s0 + $0x20] ss:$8 sps:$4 sm:$0xff]   ;;  %v449_v20 = vld [vmem:[%s589_s0 + $0x14] ss:$8 sps:$4 sm:$0xff]   ;;  %v453_v22 = vld [vmem:[%s589_s0 + $0x10] ss:$8 sps:$4 sm:$0xff]  }
  0x18   :  { %380 = vmatprep.subr.bf16.mxu0 %v439_v14  ;;  %414 = vmatprep.subr.bf16.mxu1 %v439_v14  ;;  %v451_v21 = vld [vmem:[%s589_s0 + $0x34] ss:$8 sps:$4 sm:$0xff]   ;;  %v454_v23 = vld [vmem:[%s589_s0 + $0x30] ss:$8 sps:$4 sm:$0xff]   ;;  %v367_v27 = vld [vmem:[%s591_s2] ss:$0 sm:$0xff] }
  0x19   :  { %s479_s0 = smov [#allocation3]  }
  0x1a   :  { %s332_s2 = sshll.u32 %s479_s0, 4  ;;  %s333_s2 = int_to_ptr.vmem [resolvable:$true] %s332_s2 }
  0x1b   :  { %381 = vmatpush3.bf16.msra.mxu0 %v440_v15  ;;  %422 = vmatpush3.bf16.msra.mxu1 %v440_v15  ;;  %s455_s7 = scalar_lea.vmem %s333_s2, 1024  ;;  %p460_p1 = scmp.lt.s32.totalorder %s333_s2, %s333_s2 }
  0x1c   :  { %382 = vmatprep.subr.bf16.mxu0 %v441_v16  ;;  %415 = vmatprep.subr.bf16.mxu1 %v441_v16  ;;  %p456_p0 = scmp.ne.s32.totalorder %s333_s2, %s455_s7  ;;  %p461_p2 = scmp.lt.s32.totalorder %s455_s7, %s455_s7 }
  0x1e   :  { %p462_p3 = por %p461_p2, %p460_p1 }
  0x1f   :  { %383 = vmatpush3.bf16.msra.mxu0 %v442_v17  ;;  %423 = vmatpush3.bf16.msra.mxu1 %v442_v17 }
  0x20   :  { %p463_p4 = pnand %p462_p3, %p456_p0 }
  0x22   :  { %245 = vmatmul.mubr.bf16.vlgmr.msra.gmra.mrb[0].mxu0 %v443_v18  ;;  %261 = vmatmul.mubr.bf16.vlgmr.msra.gmra.mrb[0].mxu1 %v446_v19 }
  0x23   :  { %252 = vmatprep.mubr.bf16.mxu0 %v449_v20  ;;  %268 = vmatprep.mubr.bf16.mxu1 %v451_v21 }
  0x2a   :  { %253 = vmatmul.mubr.bf16.gmra.mrb[4].mxu0 %v453_v22  ;;  %269 = vmatmul.mubr.bf16.gmra.mrb[4].mxu1 %v454_v23 }
  0xf5   :  { %v384_v24 = vpop.f32.mrb[0].mxu0  ;;  %v396_v25 = vpop.f32.mrb[0].mxu1 }
  0xf6   :  { %v385_v26 = vpop.f32.mrb[1].mxu0  ;;  %v397_v28 = vpop.f32.mrb[1].mxu1 }
  0xf7   :  { %v386_v29 = vadd.f32 %v385_v26, %v384_v24  ;;  %v398_v30 = vadd.f32 %v397_v28, %v396_v25  ;;  %v387_v31 = vpop.f32.mrb[2].mxu0  ;;  %v399_v32 = vpop.f32.mrb[2].mxu1 }
  0xf8   :  { %v388_v33 = vpop.f32.mrb[3].mxu0  ;;  %v400_v34 = vpop.f32.mrb[3].mxu1 }
  0xf9   :  { %v311_v35 = vadd.f32 %v386_v29, %v367_v27  ;;  %v315_v36 = vadd.f32 %v398_v30, %v367_v27  ;;  %v389_v37 = vadd.f32 %v388_v33, %v387_v31  ;;  %v401_v38 = vadd.f32 %v400_v34, %v399_v32 }
  0xfb   :  { %319 = vst [vmem:[#allocation3] sm:$0xff] %v311_v35  ;;  %323 = vst [vmem:[#allocation3 + $0x20] sm:$0xff] %v315_v36  ;;  %v312_v39 = vadd.f32 %v389_v37, %v367_v27  ;;  %v316_v40 = vadd.f32 %v401_v38, %v367_v27 }
  0xfd   :  { %320 = vst [vmem:[#allocation3 + $0x8] sm:$0xff] %v312_v39  ;;  %324 = vst [vmem:[#allocation3 + $0x28] sm:$0xff] %v316_v40  ;;  %v390_v41 = vpop.f32.mrb[4].mxu0  ;;  %v402_v42 = vpop.f32.mrb[4].mxu1 }
  0xfe   :  { %v391_v43 = vpop.f32.mrb[5].mxu0  ;;  %v403_v44 = vpop.f32.mrb[5].mxu1 }
  0xff   :  { %v392_v45 = vadd.f32 %v391_v43, %v390_v41  ;;  %v404_v46 = vadd.f32 %v403_v44, %v402_v42  ;;  %v393_v47 = vpop.f32.mrb[6].mxu0  ;;  %v405_v48 = vpop.f32.mrb[6].mxu1 }
 0x100   :  { %v394_v49 = vpop.f32.mrb[7].mxu0  ;;  %v406_v50 = vpop.f32.mrb[7].mxu1 }
 0x101   :  { %v313_v51 = vadd.f32 %v392_v45, %v367_v27  ;;  %v317_v52 = vadd.f32 %v404_v46, %v367_v27  ;;  %v395_v53 = vadd.f32 %v394_v49, %v393_v47  ;;  %v407_v54 = vadd.f32 %v406_v50, %v405_v48 }
 0x103   :  { %321 = vst [vmem:[#allocation3 + $0x10] sm:$0xff] %v313_v51  ;;  %325 = vst [vmem:[#allocation3 + $0x30] sm:$0xff] %v317_v52  ;;  %v314_v55 = vadd.f32 %v395_v53, %v367_v27  ;;  %v318_v56 = vadd.f32 %v407_v54, %v367_v27 }
 0x105   :  { %322 = vst [vmem:[#allocation3 + $0x18] sm:$0xff] %v314_v55  ;;  %326 = vst [vmem:[#allocation3 + $0x38] sm:$0xff] %v318_v56 }
 0x106   :  { %466 = shalt.err (!%p463_p4)
}
 0x107   :  { %s467_s10 = scalar_lea.hbm %s592_s3, 1024 }
 0x108   :  { %p468_p5 = scmp.ne.s32.totalorder %s592_s3, %s467_s10  ;;  %p471_p6 = scmp.lt.u32.totalorder %s467_s10, %s592_s3 }
 0x10a   :  { %p473_p7 = pnand %p471_p6, %p468_p5 }
 0x10c   :  { %476 = shalt.err (!%p473_p7)
}
 0x10d   :  { %s480_s15 = smov 128   ;;  %s481_s16 = smov 8  }
 0x10e   :  { %338 = dma.vmem_to_hbm [thread:$0]  %s333_s2, 1024, %s592_s3, [#allocation4], %s480_s15, %s480_s15, %s481_s16  }
 0x10f   :  { %477 = dma.done.wait [#allocation4], 1024  }
 0x110   :  { %478 = vsyncadd [#allocation4], 4294966272 }
 0x111   :  { %342 = vsyncpa [#allocation4], 1 }

</bundles_post_ra>
